<compile_context>
chip_gen: v5e
topology: v5e:2x2
jax: 0.10.0
libtpu: 0.0.40
codegen_flags: <defaults>
</compile_context>

<pallas_src>
import functools

import jax
import jax.numpy as jnp
from jax.experimental import pallas as pl
from jax.experimental.pallas import tpu as pltpu


def _outconv_fma_kernel(w_ref, b_ref, x_ref, o_ref):
    """Small-channel path: weights/bias as SMEM scalars, dense-slab VPU FMAs.

    w_ref: SMEM (C_out*C_in,) f32   b_ref: SMEM (C_out,) f32
    x_ref: VMEM (C_in, S, 128)      o_ref: VMEM (C_out, S, 128)
    """
    c_in = x_ref.shape[0]
    c_out = o_ref.shape[0]

    # One load of the whole tile; cast (if any) fused into the dense slabs.
    x = x_ref[...].astype(jnp.float32)                    # (C_in, S, 128)

    # Hoist all SMEM scalar reads out of the vector loops.
    w = [w_ref[k] for k in range(c_out * c_in)]
    b = [b_ref[o] for o in range(c_out)]

    outs = []
    for o in range(c_out):                                 # static, tiny trip counts
        acc = x[0] * w[o * c_in] + b[o]                    # bias folded into 1st term
        for i in range(1, c_in):
            acc = acc + x[i] * w[o * c_in + i]
        outs.append(acc)

    # Assemble the full (C_out, S, 128) tile and store it once (lane-dense,
    # unmasked stores; no per-row RMW).
    o_ref[...] = jnp.stack(outs, axis=0).astype(o_ref.dtype)


def _outconv_dot_kernel(w_ref, b_ref, x_ref, o_ref):
    """Large-channel path: MXU matmul, f32 accumulate.

    w_ref: VMEM (C_out, C_in)   b_ref: VMEM (C_out, 1)
    x_ref: VMEM (C_in, T)       o_ref: VMEM (C_out, T)
    """
    acc = jnp.dot(w_ref[...], x_ref[...], preferred_element_type=jnp.float32)
    o_ref[...] = (acc + b_ref[...].astype(jnp.float32)).astype(o_ref.dtype)


def _round_up(v, m):
    return ((v + m - 1) // m) * m


def _pick_tile(hw_p, unit, max_tile, want_steps):
    """Largest multiple of `unit` dividing hw_p, <= max_tile, leaving >= want_steps
    grid steps.  Constraints are relaxed in that order (divisibility mandatory)."""
    cap = max(unit, (min(max_tile, hw_p) // unit) * unit)
    best = None
    t = cap
    while t >= unit:
        if hw_p % t == 0:
            if best is None:
                best = t
            if hw_p // t >= want_steps:
                return t
        t -= unit
    return best if best is not None else hw_p


@functools.partial(jax.jit, static_argnames=("max_spatial_tile",))
def out_conv(x_nchw, weight, bias, *, max_spatial_tile=8192):
    """1x1 conv. x_nchw: (N, C_in, H, W); weight: (C_out, C_in, 1, 1); bias: (C_out,)."""
    n, c_in, h, w = x_nchw.shape
    c_out = weight.shape[0]
    hw = h * w
    itemsize = x_nchw.dtype.itemsize

    small = (c_in * c_out) <= 64          # tiny contraction -> VPU FMAs, else MXU
    want_steps = 2 if n == 1 else 1       # keep both v7x TCs busy when N == 1

    if small:
        hw_p = _round_up(hw, 128)
        # If the padded extent is large but not tileable into (8,128)-legal
        # blocks, pad a bit further so we can tile (keeps VMEM bounded).
        if hw_p > max_spatial_tile and hw_p % 1024 != 0:
            hw_p = _round_up(hw, 1024)
        if hw_p % 1024 == 0:
            t = _pick_tile(hw_p, 1024, max_spatial_tile, want_steps)
        else:
            t = hw_p                      # small full-extent block (e.g. HW = 256)
    else:
        hw_p = _round_up(hw, 128)
        # Derive the spatial tile from a VMEM budget that is safe on v7x
        # (64 MiB / TC): double-buffered in+out tiles + resident weight/bias.
        budget = 20 * 2**20
        fixed = 2 * (c_out * c_in + c_out) * itemsize
        per_t = 4 * (c_in + c_out) * itemsize
        avail = max(budget - fixed, per_t * 128)
        max_t = max(128, (avail // per_t // 128) * 128)
        t = _pick_tile(hw_p, 128, min(max_spatial_tile, max_t), want_steps)

    # Free reshape; padding (if any) is one cheap pass instead of a huge block.
    x3 = x_nchw.reshape(n, c_in, hw)
    if hw_p != hw:
        x3 = jnp.pad(x3, ((0, 0), (0, 0), (0, hw_p - hw)))

    grid = (n, hw_p // t)

    tile_bytes = 4 * (c_in + c_out) * t * itemsize        # double-buffered in+out
    if not small:
        tile_bytes += 2 * (c_out * c_in + c_out) * itemsize
    vmem_limit = int(min(40 * 2**20, max(24 * 2**20, 2 * tile_bytes)))

    if small:
        s = t // 128
        # Free contiguous split of the spatial axis -> sublane-dense slabs.
        x4 = x3.reshape(n, c_in, hw_p // 128, 128)
        w_arg = weight.reshape(c_out * c_in).astype(jnp.float32)
        b_arg = bias.astype(jnp.float32)
        in_specs = [
            pl.BlockSpec(memory_space=pltpu.MemorySpace.SMEM),
            pl.BlockSpec(memory_space=pltpu.MemorySpace.SMEM),
            pl.BlockSpec((None, c_in, s, 128), lambda nb, sb: (nb, 0, sb, 0)),
        ]
        out_spec = pl.BlockSpec((None, c_out, s, 128), lambda nb, sb: (nb, 0, sb, 0))
        out_shape = jax.ShapeDtypeStruct((n, c_out, hw_p // 128, 128), x_nchw.dtype)
        kernel = _outconv_fma_kernel
        args = (w_arg, b_arg, x4)
    else:
        w_arg = weight.reshape(c_out, c_in)
        b_arg = bias.reshape(c_out, 1)
        in_specs = [
            pl.BlockSpec((c_out, c_in), lambda nb, sb: (0, 0)),
            pl.BlockSpec((c_out, 1), lambda nb, sb: (0, 0)),
            pl.BlockSpec((None, c_in, t), lambda nb, sb: (nb, 0, sb)),
        ]
        out_spec = pl.BlockSpec((None, c_out, t), lambda nb, sb: (nb, 0, sb))
        out_shape = jax.ShapeDtypeStruct((n, c_out, hw_p), x_nchw.dtype)
        kernel = _outconv_dot_kernel
        args = (w_arg, b_arg, x3)

    y = pl.pallas_call(
        kernel,
        out_shape=out_shape,
        grid_spec=pltpu.PrefetchScalarGridSpec(
            num_scalar_prefetch=0,
            grid=grid,
            in_specs=in_specs,
            out_specs=out_spec,
        ),
        compiler_params=pltpu.CompilerParams(
            dimension_semantics=("parallel", "parallel"),
            vmem_limit_bytes=vmem_limit,
        ),
    )(*args)

    y3 = y.reshape(n, c_out, hw_p)
    if hw_p != hw:
        y3 = y3[:, :, :hw]
    return y3.reshape(n, c_out, h, w)                      # free: no data movement


if __name__ == "__main__":
    # Small shapes consistent with the module's forward: NCHW input.
    N, C_IN, C_OUT, H, W = 2, 4, 3, 16, 16

    key = jax.random.PRNGKey(0)
    kx, kw, kb = jax.random.split(key, 3)

    x = jax.random.normal(kx, (N, C_IN, H, W), dtype=jnp.float32)

    # Deterministic parameter init (Conv2d shapes: (C_out, C_in, 1, 1)).
    fan_in = C_IN  # kernel_size = 1
    bound = 1.0 / (fan_in ** 0.5)
    weight = jax.random.uniform(kw, (C_OUT, C_IN, 1, 1), jnp.float32, -bound, bound)
    bias = jax.random.uniform(kb, (C_OUT,), jnp.float32, -bound, bound)

    y = out_conv(x, weight, bias)
    y = jax.block_until_ready(y)

    # Reference check in plain JAX (same semantics as nn.Conv2d k=1).
    y_ref = (
        jnp.einsum("nchw,oc->nohw", x, weight.reshape(C_OUT, C_IN))
        + bias[None, :, None, None]
    )
    assert y.shape == (N, C_OUT, H, W)
    assert jnp.allclose(y, y_ref, atol=1e-5, rtol=1e-5)

    print("KERNEL_OK")
</pallas_src>

<mosaic_0001>
module attributes {stable_mosaic.version = 11 : i64} {
  func.func @_outconv_fma_kernel(%arg0: i32, %arg1: i32, %arg2: memref<12xf32, #tpu.memory_space<smem>>, %arg3: memref<3xf32, #tpu.memory_space<smem>>, %arg4: memref<1x4x2x128xf32, #tpu.memory_space<vmem>>, %arg5: memref<1x3x2x128xf32, #tpu.memory_space<vmem>>) attributes {dimension_semantics = [#tpu.dimension_semantics<parallel>, #tpu.dimension_semantics<parallel>], iteration_bounds = array<i64: 2, 1>, scalar_prefetch = 0 : i64, scratch_operands = 0 : i64, tpu.core_type = #tpu.core_type<tc>, window_params = [{transform_indices = @transform_0, window_bounds = array<i64: 12>}, {transform_indices = @transform_1, window_bounds = array<i64: 3>}, {transform_indices = @transform_2, window_bounds = array<i64: 1, 4, 2, 128>}, {transform_indices = @transform_3, window_bounds = array<i64: 1, 3, 2, 128>}]} {
    %c0 = arith.constant 0 : index
    %c0_0 = arith.constant 0 : index
    %c0_1 = arith.constant 0 : index
    %c0_2 = arith.constant 0 : index
    %0 = vector.load %arg4[%c0, %c0_0, %c0_1, %c0_2] : memref<1x4x2x128xf32, #tpu.memory_space<vmem>>, vector<1x4x2x128xf32>
    %1 = vector.shape_cast %0 : vector<1x4x2x128xf32> to vector<4x2x128xf32>
    %c0_3 = arith.constant 0 : index
    %2 = memref.load %arg2[%c0_3] : memref<12xf32, #tpu.memory_space<smem>>
    %c1 = arith.constant 1 : index
    %3 = memref.load %arg2[%c1] : memref<12xf32, #tpu.memory_space<smem>>
    %c2 = arith.constant 2 : index
    %4 = memref.load %arg2[%c2] : memref<12xf32, #tpu.memory_space<smem>>
    %c3 = arith.constant 3 : index
    %5 = memref.load %arg2[%c3] : memref<12xf32, #tpu.memory_space<smem>>
    %c4 = arith.constant 4 : index
    %6 = memref.load %arg2[%c4] : memref<12xf32, #tpu.memory_space<smem>>
    %c5 = arith.constant 5 : index
    %7 = memref.load %arg2[%c5] : memref<12xf32, #tpu.memory_space<smem>>
    %c6 = arith.constant 6 : index
    %8 = memref.load %arg2[%c6] : memref<12xf32, #tpu.memory_space<smem>>
    %c7 = arith.constant 7 : index
    %9 = memref.load %arg2[%c7] : memref<12xf32, #tpu.memory_space<smem>>
    %c8 = arith.constant 8 : index
    %10 = memref.load %arg2[%c8] : memref<12xf32, #tpu.memory_space<smem>>
    %c9 = arith.constant 9 : index
    %11 = memref.load %arg2[%c9] : memref<12xf32, #tpu.memory_space<smem>>
    %c10 = arith.constant 10 : index
    %12 = memref.load %arg2[%c10] : memref<12xf32, #tpu.memory_space<smem>>
    %c11 = arith.constant 11 : index
    %13 = memref.load %arg2[%c11] : memref<12xf32, #tpu.memory_space<smem>>
    %c0_4 = arith.constant 0 : index
    %14 = memref.load %arg3[%c0_4] : memref<3xf32, #tpu.memory_space<smem>>
    %c1_5 = arith.constant 1 : index
    %15 = memref.load %arg3[%c1_5] : memref<3xf32, #tpu.memory_space<smem>>
    %c2_6 = arith.constant 2 : index
    %16 = memref.load %arg3[%c2_6] : memref<3xf32, #tpu.memory_space<smem>>
    %17 = vector.extract_strided_slice %1 {offsets = [0, 0, 0], sizes = [1, 2, 128], strides = [1, 1, 1]} : vector<4x2x128xf32> to vector<1x2x128xf32>
    %18 = vector.shape_cast %17 : vector<1x2x128xf32> to vector<2x128xf32>
    %19 = vector.broadcast %2 : f32 to vector<2x128xf32>
    %20 = arith.mulf %18, %19 : vector<2x128xf32>
    %21 = vector.broadcast %14 : f32 to vector<2x128xf32>
    %22 = arith.addf %20, %21 : vector<2x128xf32>
    %23 = vector.extract_strided_slice %1 {offsets = [1, 0, 0], sizes = [1, 2, 128], strides = [1, 1, 1]} : vector<4x2x128xf32> to vector<1x2x128xf32>
    %24 = vector.shape_cast %23 : vector<1x2x128xf32> to vector<2x128xf32>
    %25 = vector.broadcast %3 : f32 to vector<2x128xf32>
    %26 = arith.mulf %24, %25 : vector<2x128xf32>
    %27 = arith.addf %22, %26 : vector<2x128xf32>
    %28 = vector.extract_strided_slice %1 {offsets = [2, 0, 0], sizes = [1, 2, 128], strides = [1, 1, 1]} : vector<4x2x128xf32> to vector<1x2x128xf32>
    %29 = vector.shape_cast %28 : vector<1x2x128xf32> to vector<2x128xf32>
    %30 = vector.broadcast %4 : f32 to vector<2x128xf32>
    %31 = arith.mulf %29, %30 : vector<2x128xf32>
    %32 = arith.addf %27, %31 : vector<2x128xf32>
    %33 = vector.extract_strided_slice %1 {offsets = [3, 0, 0], sizes = [1, 2, 128], strides = [1, 1, 1]} : vector<4x2x128xf32> to vector<1x2x128xf32>
    %34 = vector.shape_cast %33 : vector<1x2x128xf32> to vector<2x128xf32>
    %35 = vector.broadcast %5 : f32 to vector<2x128xf32>
    %36 = arith.mulf %34, %35 : vector<2x128xf32>
    %37 = arith.addf %32, %36 : vector<2x128xf32>
    %38 = vector.extract_strided_slice %1 {offsets = [0, 0, 0], sizes = [1, 2, 128], strides = [1, 1, 1]} : vector<4x2x128xf32> to vector<1x2x128xf32>
    %39 = vector.shape_cast %38 : vector<1x2x128xf32> to vector<2x128xf32>
    %40 = vector.broadcast %6 : f32 to vector<2x128xf32>
    %41 = arith.mulf %39, %40 : vector<2x128xf32>
    %42 = vector.broadcast %15 : f32 to vector<2x128xf32>
    %43 = arith.addf %41, %42 : vector<2x128xf32>
    %44 = vector.extract_strided_slice %1 {offsets = [1, 0, 0], sizes = [1, 2, 128], strides = [1, 1, 1]} : vector<4x2x128xf32> to vector<1x2x128xf32>
    %45 = vector.shape_cast %44 : vector<1x2x128xf32> to vector<2x128xf32>
    %46 = vector.broadcast %7 : f32 to vector<2x128xf32>
    %47 = arith.mulf %45, %46 : vector<2x128xf32>
    %48 = arith.addf %43, %47 : vector<2x128xf32>
    %49 = vector.extract_strided_slice %1 {offsets = [2, 0, 0], sizes = [1, 2, 128], strides = [1, 1, 1]} : vector<4x2x128xf32> to vector<1x2x128xf32>
    %50 = vector.shape_cast %49 : vector<1x2x128xf32> to vector<2x128xf32>
    %51 = vector.broadcast %8 : f32 to vector<2x128xf32>
    %52 = arith.mulf %50, %51 : vector<2x128xf32>
    %53 = arith.addf %48, %52 : vector<2x128xf32>
    %54 = vector.extract_strided_slice %1 {offsets = [3, 0, 0], sizes = [1, 2, 128], strides = [1, 1, 1]} : vector<4x2x128xf32> to vector<1x2x128xf32>
    %55 = vector.shape_cast %54 : vector<1x2x128xf32> to vector<2x128xf32>
    %56 = vector.broadcast %9 : f32 to vector<2x128xf32>
    %57 = arith.mulf %55, %56 : vector<2x128xf32>
    %58 = arith.addf %53, %57 : vector<2x128xf32>
    %59 = vector.extract_strided_slice %1 {offsets = [0, 0, 0], sizes = [1, 2, 128], strides = [1, 1, 1]} : vector<4x2x128xf32> to vector<1x2x128xf32>
    %60 = vector.shape_cast %59 : vector<1x2x128xf32> to vector<2x128xf32>
    %61 = vector.broadcast %10 : f32 to vector<2x128xf32>
    %62 = arith.mulf %60, %61 : vector<2x128xf32>
    %63 = vector.broadcast %16 : f32 to vector<2x128xf32>
    %64 = arith.addf %62, %63 : vector<2x128xf32>
    %65 = vector.extract_strided_slice %1 {offsets = [1, 0, 0], sizes = [1, 2, 128], strides = [1, 1, 1]} : vector<4x2x128xf32> to vector<1x2x128xf32>
    %66 = vector.shape_cast %65 : vector<1x2x128xf32> to vector<2x128xf32>
    %67 = vector.broadcast %11 : f32 to vector<2x128xf32>
    %68 = arith.mulf %66, %67 : vector<2x128xf32>
    %69 = arith.addf %64, %68 : vector<2x128xf32>
    %70 = vector.extract_strided_slice %1 {offsets = [2, 0, 0], sizes = [1, 2, 128], strides = [1, 1, 1]} : vector<4x2x128xf32> to vector<1x2x128xf32>
    %71 = vector.shape_cast %70 : vector<1x2x128xf32> to vector<2x128xf32>
    %72 = vector.broadcast %12 : f32 to vector<2x128xf32>
    %73 = arith.mulf %71, %72 : vector<2x128xf32>
    %74 = arith.addf %69, %73 : vector<2x128xf32>
    %75 = vector.extract_strided_slice %1 {offsets = [3, 0, 0], sizes = [1, 2, 128], strides = [1, 1, 1]} : vector<4x2x128xf32> to vector<1x2x128xf32>
    %76 = vector.shape_cast %75 : vector<1x2x128xf32> to vector<2x128xf32>
    %77 = vector.broadcast %13 : f32 to vector<2x128xf32>
    %78 = arith.mulf %76, %77 : vector<2x128xf32>
    %79 = arith.addf %74, %78 : vector<2x128xf32>
    %80 = vector.shape_cast %37 : vector<2x128xf32> to vector<1x2x128xf32>
    %81 = vector.shape_cast %58 : vector<2x128xf32> to vector<1x2x128xf32>
    %82 = vector.shape_cast %79 : vector<2x128xf32> to vector<1x2x128xf32>
    %83 = tpu.concatenate %80, %81, %82 in 0 : vector<1x2x128xf32>, vector<1x2x128xf32>, vector<1x2x128xf32> -> vector<3x2x128xf32>
    %c0_7 = arith.constant 0 : index
    %c0_8 = arith.constant 0 : index
    %c0_9 = arith.constant 0 : index
    %c0_10 = arith.constant 0 : index
    %84 = vector.load %arg5[%c0_7, %c0_8, %c0_9, %c0_10] : memref<1x3x2x128xf32, #tpu.memory_space<vmem>>, vector<1x3x2x128xf32>
    %85 = vector.shape_cast %84 : vector<1x3x2x128xf32> to vector<3x2x128xf32>
    %86 = vector.shape_cast %83 : vector<3x2x128xf32> to vector<1x3x2x128xf32>
    tpu.vector_store %arg5[%c0_7, %c0_8, %c0_9, %c0_10], %86 {strides = array<i32>} : memref<1x3x2x128xf32, #tpu.memory_space<vmem>>, vector<1x3x2x128xf32>,
    return
  }
  func.func @transform_0(%arg0: i32, %arg1: i32) -> i32 {
    %c0_i32 = arith.constant 0 : i32
    %c0_i32_0 = arith.constant 0 : i32
    return %c0_i32 : i32
  }
  func.func @transform_1(%arg0: i32, %arg1: i32) -> i32 {
    %c0_i32 = arith.constant 0 : i32
    %c0_i32_0 = arith.constant 0 : i32
    return %c0_i32 : i32
  }
  func.func @transform_2(%arg0: i32, %arg1: i32) -> (i32, i32, i32, i32) {
    %c0_i32 = arith.constant 0 : i32
    %c0_i32_0 = arith.constant 0 : i32
    %c0_i32_1 = arith.constant 0 : i32
    return %arg0, %c0_i32, %arg1, %c0_i32_0 : i32, i32, i32, i32
  }
  func.func @transform_3(%arg0: i32, %arg1: i32) -> (i32, i32, i32, i32) {
    %c0_i32 = arith.constant 0 : i32
    %c0_i32_0 = arith.constant 0 : i32
    %c0_i32_1 = arith.constant 0 : i32
    return %arg0, %c0_i32, %arg1, %c0_i32_0 : i32, i32, i32, i32
  }
}

</mosaic_0001>

<bundles_post_ra>
// kernel: out_conv.1
= control target key start
LH: loop header
LB: loop body
LE: loop exit
PB: predicated region body
PF: predicated region fallthrough
CT: control target
= control target key end

     0   :  { %8 = vsyncpa [#allocation3], 0  ;;  %s619_s0 = inlined_call_operand.vmem [shape: f32[12], index: 0, kind: input, shape index: {}]   ;;  %s620_s1 = inlined_call_operand.vmem [shape: f32[3], index: 1, kind: input, shape index: {}]   ;;  %s621_s2 = inlined_call_operand.vmem [shape: f32[2,4,2,128], index: 2, kind: input, shape index: {}]   ;;  %s622_s3 = inlined_call_operand.vmem [shape: f32[2,3,2,128], index: 3, kind: output, shape index: {}]  }
   0x1   :  { %9 = vsyncpa [#allocation5], 0  ;;  %s554_s12 = smov 0   ;;  %s556_s13 = smov 0  }
   0x2   :  { %s558_s14 = smov 0  }
   0x3 LB: > { %s396_s15 = sadd.s32 4294967295, %s530_s14   ;;  %s27_s16 = sadd.s32 1, %s526_s13  ;;  %s530_s14 = sphi %s558_s14, %s15_s14   ;;  %s526_s13 = sphi %s556_s13, %s625_s13   ;;  %s522_s12 = sphi %s554_s12, %s624_s12  }
   0x4   : > { %p29_p0 = scmp.ge.s32.totalorder %s27_s16, 2  ;;  %p398_p1 = scmp.ge.s32.totalorder %s530_s14, 1 }
   0x5   : > { %p130_p2 = scmp.lt.s32.totalorder %s530_s14, 3  ;;  %p575_p4 = scmp.eq.s32.totalorder %s396_s15, 0 }
   0x6   : > { %s627_s16 = smov (%p29_p0, %s27_s16), 0  ;;  %s142_s20 = sshll.u32 %s619_s0, 4  ;;  %s143_s20 = int_to_ptr.vmem [resolvable:$true] %s142_s20 }
   0x7   : > { %p131_p3 = pnand %p398_p1, %p130_p2  ;;  %s152_s23 = sshll.u32 %s620_s1, 4  ;;  %s153_s23 = int_to_ptr.vmem [resolvable:$true] %s152_s23 }
   0x8   : > { %s532_s24 = smov [#allocation2]   ;;  %s533_s25 = smov [#allocation4]  }
   0x9   : > { %p433_p5 = pneg %p131_p3 }
   0xa   : > { %176 = sbr.rel (%p131_p3) target bundleno = 50 (0x32), region = 32 }
   0xb   : > { %p434_p6 = pnand %p575_p4, %p433_p5 }
   0xd   : > { %436 = dma.vmem_to_smem (!%p434_p6), %s143_s20, 16, %s532_s24, [#allocation3]  }
   0xe   : > { %439 = dma.vmem_to_smem (!%p434_p6), %s153_s23, 16, %s533_s25, [#allocation5]  }
   0xf   : > { %513 = dma.done.wait (%p575_p4), [#allocation3], 16  }
  0x10   : > { %515 = vsyncadd (%p575_p4), [#allocation3], 4294967280 }
  0x11   : > { %517 = dma.done.wait (%p575_p4), [#allocation5], 16  }
  0x12   : > { %519 = vsyncadd (%p575_p4), [#allocation5], 4294967280 }
  0x13   : > { %188 = sfence }
  0x14   : > { %p213_p7 = scmp.lt.s32.totalorder %s522_s12, 1  ;;  %s233_s26 = sld [smem:[#allocation2]] }
  0x15   : > { %s408_s27 = sld [smem:[#allocation2 + $0x1]] }
  0x16   : > { %s629_s12 = smov (!%p213_p7, %s522_s12), 1  ;;  %s409_s28 = sld [smem:[#allocation2 + $0x2]] }
  0x17   : > { %s423_s29 = sshll.u32 %s629_s12, 3  ;;  %s410_s6 = sld [smem:[#allocation2 + $0x3]] }
  0x18   : > { %s220_s5 = scalar_lea.vmem %s621_s2, %s423_s29  ;;  %s245_s7 = sld [smem:[#allocation4]] }
  0x19   : > { %v229_v0 = vld [vmem:[%s220_s5] sm:$0x3]  ;;  %s411_s8 = sld [smem:[#allocation2 + $0x4]]  ;;  %v230_v2 = vld [vmem:[%s220_s5 + $0x2] sm:$0x3]  ;;  %s424_s19 = smul.u32 6, %s629_s12 }
  0x1a   : > { %v248_v1 = vstv %s233_s26  ;;  %s412_s9 = sld [smem:[#allocation2 + $0x5]]  ;;  %v231_v5 = vld [vmem:[%s220_s5 + $0x4] sm:$0x3]  ;;  %v232_v8 = vld [vmem:[%s220_s5 + $0x6] sm:$0x3] }
  0x1b   : > { %v252_v3 = vstv %s408_s27  ;;  %v249_v4 = vmul.f32 %v248_v1, %v229_v0  ;;  %s413_s10 = sld [smem:[#allocation2 + $0x6]]  ;;  %s228_s25 = scalar_lea.vmem %s622_s3, %s424_s19 }
  0x1c   : > { %v255_v6 = vstv %s409_s28  ;;  %s603_s11 = sld [smem:[#allocation2 + $0x7]]  ;;  %v253_v7 = vmul.f32 %v252_v3, %v230_v2 }
  0x1d   : > { %s419_s15 = sld [smem:[#allocation4 + $0x1]]  ;;  %v258_v10 = vstv %s410_s6  ;;  %v256_v12 = vmul.f32 %v255_v6, %v231_v5 }
  0x1e   : > { %v250_v9 = vstv %s245_s7  ;;  %s415_s17 = sld [smem:[#allocation2 + $0x8]]  ;;  %v259_v17 = vmul.f32 %v258_v10, %v232_v8 }
  0x1f   : > { %v251_v11 = vadd.f32 %v250_v9, %v249_v4  ;;  %v261_v13 = vstv %s411_s8  ;;  %s416_s18 = sld [smem:[#allocation2 + $0x9]] }
  0x20   : > { %v262_v14 = vmul.f32 %v261_v13, %v229_v0  ;;  %v265_v15 = vstv %s412_s9  ;;  %s417_s20 = sld [smem:[#allocation2 + $0xa]] }
  0x21   : > { %v254_v16 = vadd.f32 %v253_v7, %v251_v11  ;;  %v268_v18 = vstv %s413_s10  ;;  %s418_s21 = sld [smem:[#allocation2 + $0xb]]  ;;  %v266_v19 = vmul.f32 %v265_v15, %v230_v2 }
  0x22   : > { %s420_s22 = sld [smem:[#allocation4 + $0x2]]  ;;  %v271_v22 = vstv %s603_s11  ;;  %v269_v24 = vmul.f32 %v268_v18, %v231_v5 }
  0x23   : > { %v257_v20 = vadd.f32 %v256_v12, %v254_v16  ;;  %v263_v21 = vstv %s419_s15  ;;  %v272_v30 = vmul.f32 %v271_v22, %v232_v8 }
  0x24   : > { %v264_v23 = vadd.f32 %v263_v21, %v262_v14  ;;  %v274_v25 = vstv %s415_s17 }
  0x25   : > { %v260_v26 = vadd.f32 %v259_v17, %v257_v20  ;;  %v275_v27 = vmul.f32 %v274_v25, %v229_v0  ;;  %v278_v28 = vstv %s416_s18 }
  0x26   : > { %v267_v29 = vadd.f32 %v266_v19, %v264_v23  ;;  %v281_v31 = vstv %s417_s20  ;;  %v279_v32 = vmul.f32 %v278_v28, %v230_v2 }
  0x27   : > { %287 = vst [vmem:[%s228_s25] sm:$0x3] %v260_v26  ;;  %v284_v35 = vstv %s418_s21  ;;  %v282_v37 = vmul.f32 %v281_v31, %v231_v5 }
  0x28   : > { %v270_v33 = vadd.f32 %v269_v24, %v267_v29  ;;  %v276_v34 = vstv %s420_s22  ;;  %v285_v40 = vmul.f32 %v284_v35, %v232_v8 }
  0x29   : > { %v277_v36 = vadd.f32 %v276_v34, %v275_v27 }
  0x2a   : > { %v273_v38 = vadd.f32 %v272_v30, %v270_v33 }
  0x2b   : > { %v280_v39 = vadd.f32 %v279_v32, %v277_v36 }
  0x2c   : > { %288 = vst [vmem:[%s228_s25 + $0x2] sm:$0x3] %v273_v38 }
  0x2d   : > { %v283_v41 = vadd.f32 %v282_v37, %v280_v39 }
  0x2f   : > { %v286_v42 = vadd.f32 %v285_v40, %v283_v41 }
  0x31   : > { %289 = vst [vmem:[%s228_s25 + $0x4] sm:$0x3] %v286_v42 }
  0x32 PF: > { %s15_s14 = sadd.s32 1, %s530_s14   ;;  %s624_s12 = smov %s526_s13 }
  0x33   : > { %p12_p8 = scmp.ge.s32.totalorder %s15_s14, 4   ;;  %s625_s13 = smov %s627_s16 }
  0x35   :  { %14 = sbr.rel (!%p12_p8) target bundleno = 3 (0x3), region = 71 }
  0x3a   :  { %317 = vsyncpa [#allocation3], 1 }
  0x3b   :  { %319 = vsyncpa [#allocation3 + $0x1], 1 }
  0x3c   :  { %320 = vsyncpa [#allocation5], 1 }

</bundles_post_ra>
